<compile_context>
chip_gen: v6e
topology: v6e:2x2x1
jax: 0.10.0
libtpu: 0.0.40
codegen_flags: <defaults>
</compile_context>

<pallas_src>
import functools
import math

import jax
import jax.numpy as jnp
from jax import lax
from jax.experimental import pallas as pl
from jax.experimental.pallas import tpu as pltpu

# Explicit scoped-VMEM budget: above the 32 MiB default, below v7x's 64 MiB
# physical VMEM so the same tiling budget is valid on all three generations.
VMEM_LIMIT_BYTES = 48 * 1024 * 1024


# ---------------------------------------------------------------------------
# Pass 1: fused QKV projection.
# ---------------------------------------------------------------------------
def qkv_proj_kernel(x_ref, wqkv_ref, bqkv_ref, q_ref, k_ref, v_ref, *,
                    scale, n_hidden):
    x = x_ref[...].astype(jnp.bfloat16)                                # (Tq, D)
    # bf16 MXU operands, f32 accumulation.
    qkv = jnp.dot(x, wqkv_ref[...],
                  preferred_element_type=jnp.float32) + bqkv_ref[...]  # (Tq, 3H)
    # Static, lane-tile-aligned slices; fold 1/sqrt(vect_dim) into q here so
    # the O(S^2) score matrix never needs a VPU scale.
    q_ref[...] = (qkv[:, :n_hidden] * scale).astype(q_ref.dtype)
    k_ref[...] = qkv[:, n_hidden:2 * n_hidden].astype(k_ref.dtype)
    v_ref[...] = qkv[:, 2 * n_hidden:].astype(v_ref.dtype)


# ---------------------------------------------------------------------------
# Pass 2: flash-style attention + residual + LayerNorm.
#   grid = (q tiles [parallel], kv tiles [arbitrary, last]).
# ---------------------------------------------------------------------------
def flash_attn_ln_kernel(q_ref, k_ref, v_ref, x_ref, gamma_ref, beta_ref,
                         o_ref, m_sc, l_sc, acc_sc):
    ki = pl.program_id(1)

    @pl.when(ki == 0)
    def _():
        m_sc[...] = jnp.full_like(m_sc, -jnp.inf)
        l_sc[...] = jnp.zeros_like(l_sc)
        acc_sc[...] = jnp.zeros_like(acc_sc)

    # Scores: contract on k's last (H) dim -> k stays H-major, no transpose
    # materialized before the MXU push.  q already carries the scale.
    s = lax.dot_general(q_ref[...], k_ref[...],
                        dimension_numbers=(((1,), (1,)), ((), ())),
                        preferred_element_type=jnp.float32)            # (Tq, Tk)

    # Online softmax (un-normalized p; normalization deferred to finalize).
    m_prev = m_sc[...]
    m_new = jnp.maximum(m_prev, jnp.max(s, axis=1, keepdims=True))
    alpha = jnp.exp(m_prev - m_new)
    p = jnp.exp(s - m_new)
    l_sc[...] = alpha * l_sc[...] + jnp.sum(p, axis=1, keepdims=True)
    acc_sc[...] = alpha * acc_sc[...] + jnp.dot(
        p.astype(v_ref.dtype), v_ref[...], preferred_element_type=jnp.float32)
    m_sc[...] = m_new

    @pl.when(ki == pl.num_programs(1) - 1)
    def _():
        # Deferred normalization: O(S*H) multiply, EUP reciprocal.
        inv_l = pl.reciprocal(l_sc[...], approx=True)
        out = acc_sc[...] * inv_l + x_ref[...].astype(jnp.float32)     # residual

        # LayerNorm (eps = 1e-5, PyTorch default), single pass statistics.
        n = out.shape[-1]
        row_sum = jnp.sum(out, axis=-1, keepdims=True)
        row_sq = jnp.sum(out * out, axis=-1, keepdims=True)
        mu = row_sum * (1.0 / n)
        var = row_sq * (1.0 / n) - mu * mu
        norm = (out - mu) * lax.rsqrt(var + 1e-5)
        o_ref[...] = (norm * gamma_ref[...] + beta_ref[...]).astype(o_ref.dtype)


# ---------------------------------------------------------------------------
# Wrappers.
# ---------------------------------------------------------------------------
def fuse_qkv_params(wq, bq, wk, bk, wv, bv):
    """One-time parameter setup (NOT per forward): fuse QKV weights/biases."""
    wqkv = jnp.concatenate([wq, wk, wv], axis=1).astype(jnp.bfloat16)  # (D, 3H)
    bqkv = jnp.concatenate([bq, bk, bv], axis=0).reshape(1, -1)        # (1, 3H) f32
    return wqkv, bqkv


def self_attention(x, wqkv, bqkv, gamma, beta, vect_dim, *,
                   block_q=128, block_k=128):
    """x: (S, D) f32.  wqkv: (D, 3H) bf16, bqkv: (1, 3H) f32 (from fuse_qkv_params)."""
    S, D = x.shape
    H = wqkv.shape[1] // 3
    assert H == D, "residual `out += x` requires n_hidden == vect_dim"
    block_q = min(block_q, S)
    block_k = min(block_k, S)
    assert S % block_q == 0 and S % block_k == 0
    scale = 1.0 / math.sqrt(float(vect_dim))

    gamma2 = gamma.reshape(1, H)
    beta2 = beta.reshape(1, H)

    # ---- pass 1: fused QKV projection (bf16 outputs) ----------------------
    proj_cost = pl.CostEstimate(
        flops=2 * S * D * 3 * H,
        transcendentals=0,
        bytes_accessed=4 * S * D + 2 * D * 3 * H + 4 * 3 * H + 2 * 3 * S * H)
    q, k, v = pl.pallas_call(
        functools.partial(qkv_proj_kernel, scale=scale, n_hidden=H),
        out_shape=(jax.ShapeDtypeStruct((S, H), jnp.bfloat16),) * 3,
        grid=(S // block_q,),
        in_specs=[
            pl.BlockSpec((block_q, D), lambda i: (i, 0)),      # x row tile
            pl.BlockSpec((D, 3 * H), lambda i: (0, 0)),        # resident Wqkv
            pl.BlockSpec((1, 3 * H), lambda i: (0, 0)),        # resident bqkv
        ],
        out_specs=(pl.BlockSpec((block_q, H), lambda i: (i, 0)),) * 3,
        compiler_params=pltpu.CompilerParams(
            dimension_semantics=("parallel",),
            vmem_limit_bytes=VMEM_LIMIT_BYTES),
        cost_estimate=proj_cost,
    )(x, wqkv, bqkv)

    # ---- pass 2: flash attention + residual + LayerNorm -------------------
    attn_cost = pl.CostEstimate(
        flops=4 * S * S * H + 10 * S * H,
        transcendentals=S * S + 2 * S,
        bytes_accessed=2 * 3 * S * H + 4 * S * D + 4 * S * H + 4 * 2 * H)
    out = pl.pallas_call(
        flash_attn_ln_kernel,
        out_shape=jax.ShapeDtypeStruct((S, H), x.dtype),
        grid=(S // block_q, S // block_k),
        in_specs=[
            pl.BlockSpec((block_q, H), lambda qi, ki: (qi, 0)),   # q (pre-scaled)
            pl.BlockSpec((block_k, H), lambda qi, ki: (ki, 0)),   # k
            pl.BlockSpec((block_k, H), lambda qi, ki: (ki, 0)),   # v
            pl.BlockSpec((block_q, D), lambda qi, ki: (qi, 0)),   # x (residual)
            pl.BlockSpec((1, H), lambda qi, ki: (0, 0)),          # gamma
            pl.BlockSpec((1, H), lambda qi, ki: (0, 0)),          # beta
        ],
        out_specs=pl.BlockSpec((block_q, H), lambda qi, ki: (qi, 0)),
        scratch_shapes=[
            pltpu.VMEM((block_q, 1), jnp.float32),   # running row max m
            pltpu.VMEM((block_q, 1), jnp.float32),   # running denominator l
            pltpu.VMEM((block_q, H), jnp.float32),   # un-normalized accumulator
        ],
        compiler_params=pltpu.CompilerParams(
            dimension_semantics=("parallel", "arbitrary"),
            vmem_limit_bytes=VMEM_LIMIT_BYTES),
        cost_estimate=attn_cost,
    )(q, k, v, x, gamma2, beta2)
    return out


def reference(x, wq, bq, wk, bk, wv, bv, gamma, beta, vect_dim):
    q = x @ wq + bq
    k = x @ wk + bk
    v = x @ wv + bv
    s = (q @ k.T) / jnp.sqrt(jnp.float32(vect_dim))
    p = jax.nn.softmax(s, axis=1)
    out = p @ v + x
    mu = out.mean(-1, keepdims=True)
    var = ((out - mu) ** 2).mean(-1, keepdims=True)
    return (out - mu) / jnp.sqrt(var + 1e-5) * gamma + beta


if __name__ == "__main__":
    # Lane-dense demo shapes (residual requires n_hidden == vect_dim); 128
    # lanes -> unmasked stores, 128-row tiles satisfy the (8,128) constraint
    # and exercise a real (2, 2) flash grid.
    SEQ, VECT_DIM, N_HIDDEN = 256, 128, 128

    key = jax.random.PRNGKey(0)
    kx, kq, kbq, kk, kbk, kv, kbv = jax.random.split(key, 7)

    x = jax.random.normal(kx, (SEQ, VECT_DIM), jnp.float32)

    # nn.Linear-style init (uniform in +-1/sqrt(fan_in)), stored as (in, out).
    bound = 1.0 / (VECT_DIM ** 0.5)
    wq = jax.random.uniform(kq, (VECT_DIM, N_HIDDEN), jnp.float32, -bound, bound)
    bq = jax.random.uniform(kbq, (N_HIDDEN,), jnp.float32, -bound, bound)
    wk = jax.random.uniform(kk, (VECT_DIM, N_HIDDEN), jnp.float32, -bound, bound)
    bk = jax.random.uniform(kbk, (N_HIDDEN,), jnp.float32, -bound, bound)
    wv = jax.random.uniform(kv, (VECT_DIM, N_HIDDEN), jnp.float32, -bound, bound)
    bv = jax.random.uniform(kbv, (N_HIDDEN,), jnp.float32, -bound, bound)
    gamma = jnp.ones((N_HIDDEN,), jnp.float32)   # LayerNorm default init
    beta = jnp.zeros((N_HIDDEN,), jnp.float32)

    # Parameter-setup-time fusion (done once, not per forward call).
    wqkv, bqkv = fuse_qkv_params(wq, bq, wk, bk, wv, bv)

    out = self_attention(x, wqkv, bqkv, gamma, beta, VECT_DIM)
    out = jax.block_until_ready(out)

    ref = reference(x, wq, bq, wk, bk, wv, bv, gamma, beta, VECT_DIM)
    assert out.shape == (SEQ, N_HIDDEN)
    err = jnp.max(jnp.abs(out - ref))
    # Tolerance widened vs. f32 reference: bf16 MXU operands (~0.4% relative)
    # plus approx=True EUP reciprocal in the softmax normalization.
    assert jnp.allclose(out, ref, atol=3e-2, rtol=3e-2), f"max abs diff {err}"

    print("KERNEL_OK")
</pallas_src>

<mosaic_0001>
module attributes {stable_mosaic.version = 11 : i64} {
  func.func @qkv_proj_kernel(%arg0: i32, %arg1: memref<128x128xf32, #tpu.memory_space<vmem>>, %arg2: memref<128x384xbf16, #tpu.memory_space<vmem>>, %arg3: memref<1x384xf32, #tpu.memory_space<vmem>>, %arg4: memref<128x128xbf16, #tpu.memory_space<vmem>>, %arg5: memref<128x128xbf16, #tpu.memory_space<vmem>>, %arg6: memref<128x128xbf16, #tpu.memory_space<vmem>>) attributes {dimension_semantics = [#tpu.dimension_semantics<parallel>], iteration_bounds = array<i64: 2>, scalar_prefetch = 0 : i64, scratch_operands = 0 : i64, tpu.core_type = #tpu.core_type<tc>, window_params = [{transform_indices = @transform_0, window_bounds = array<i64: 128, 128>}, {pipeline_mode = #tpu.pipeline_mode<synchronous>, transform_indices = @transform_1, window_bounds = array<i64: 128, 384>}, {pipeline_mode = #tpu.pipeline_mode<synchronous>, transform_indices = @transform_2, window_bounds = array<i64: 1, 384>}, {transform_indices = @transform_3, window_bounds = array<i64: 128, 128>}, {transform_indices = @transform_4, window_bounds = array<i64: 128, 128>}, {transform_indices = @transform_5, window_bounds = array<i64: 128, 128>}]} {
    %c0 = arith.constant 0 : index
    %c0_0 = arith.constant 0 : index
    %0 = vector.load %arg1[%c0, %c0_0] : memref<128x128xf32, #tpu.memory_space<vmem>>, vector<128x128xf32>
    %1 = arith.truncf %0 : vector<128x128xf32> to vector<128x128xbf16>
    %c0_1 = arith.constant 0 : index
    %c0_2 = arith.constant 0 : index
    %2 = vector.load %arg2[%c0_1, %c0_2] : memref<128x384xbf16, #tpu.memory_space<vmem>>, vector<128x384xbf16>
    %cst = arith.constant dense<0.000000e+00> : vector<128x384xf32>
    %3 = tpu.matmul %1, %2, %cst {dimension_numbers = #tpu.dot_dimension_numbers<[1], [0], [0], [1], [0, 0, 1, 1], [], []>} : vector<128x128xbf16>, vector<128x384xbf16>, vector<128x384xf32> -> vector<128x384xf32>
    %c0_3 = arith.constant 0 : index
    %c0_4 = arith.constant 0 : index
    %4 = vector.load %arg3[%c0_3, %c0_4] : memref<1x384xf32, #tpu.memory_space<vmem>>, vector<1x384xf32>
    %5 = vector.broadcast %4 : vector<1x384xf32> to vector<128x384xf32>
    %6 = arith.addf %3, %5 : vector<128x384xf32>
    %7 = vector.extract_strided_slice %6 {offsets = [0, 0], sizes = [128, 128], strides = [1, 1]} : vector<128x384xf32> to vector<128x128xf32>
    %cst_5 = arith.constant 0.0883883461 : f32
    %8 = vector.broadcast %cst_5 : f32 to vector<128x128xf32>
    %9 = arith.mulf %7, %8 : vector<128x128xf32>
    %10 = arith.truncf %9 : vector<128x128xf32> to vector<128x128xbf16>
    %c0_6 = arith.constant 0 : index
    %c0_7 = arith.constant 0 : index
    %11 = vector.load %arg4[%c0_6, %c0_7] : memref<128x128xbf16, #tpu.memory_space<vmem>>, vector<128x128xbf16>
    tpu.vector_store %arg4[%c0_6, %c0_7], %10 {strides = array<i32>} : memref<128x128xbf16, #tpu.memory_space<vmem>>, vector<128x128xbf16>,
    %12 = vector.extract_strided_slice %6 {offsets = [0, 128], sizes = [128, 128], strides = [1, 1]} : vector<128x384xf32> to vector<128x128xf32>
    %13 = arith.truncf %12 : vector<128x128xf32> to vector<128x128xbf16>
    %c0_8 = arith.constant 0 : index
    %c0_9 = arith.constant 0 : index
    %14 = vector.load %arg5[%c0_8, %c0_9] : memref<128x128xbf16, #tpu.memory_space<vmem>>, vector<128x128xbf16>
    tpu.vector_store %arg5[%c0_8, %c0_9], %13 {strides = array<i32>} : memref<128x128xbf16, #tpu.memory_space<vmem>>, vector<128x128xbf16>,
    %15 = vector.extract_strided_slice %6 {offsets = [0, 256], sizes = [128, 128], strides = [1, 1]} : vector<128x384xf32> to vector<128x128xf32>
    %16 = arith.truncf %15 : vector<128x128xf32> to vector<128x128xbf16>
    %c0_10 = arith.constant 0 : index
    %c0_11 = arith.constant 0 : index
    %17 = vector.load %arg6[%c0_10, %c0_11] : memref<128x128xbf16, #tpu.memory_space<vmem>>, vector<128x128xbf16>
    tpu.vector_store %arg6[%c0_10, %c0_11], %16 {strides = array<i32>} : memref<128x128xbf16, #tpu.memory_space<vmem>>, vector<128x128xbf16>,
    return
  }
  func.func @transform_0(%arg0: i32) -> (i32, i32) {
    %c0_i32 = arith.constant 0 : i32
    %c0_i32_0 = arith.constant 0 : i32
    return %arg0, %c0_i32 : i32, i32
  }
  func.func @transform_1(%arg0: i32) -> (i32, i32) {
    %c0_i32 = arith.constant 0 : i32
    %c0_i32_0 = arith.constant 0 : i32
    %c0_i32_1 = arith.constant 0 : i32
    return %c0_i32, %c0_i32_0 : i32, i32
  }
  func.func @transform_2(%arg0: i32) -> (i32, i32) {
    %c0_i32 = arith.constant 0 : i32
    %c0_i32_0 = arith.constant 0 : i32
    %c0_i32_1 = arith.constant 0 : i32
    return %c0_i32, %c0_i32_0 : i32, i32
  }
  func.func @transform_3(%arg0: i32) -> (i32, i32) {
    %c0_i32 = arith.constant 0 : i32
    %c0_i32_0 = arith.constant 0 : i32
    return %arg0, %c0_i32 : i32, i32
  }
  func.func @transform_4(%arg0: i32) -> (i32, i32) {
    %c0_i32 = arith.constant 0 : i32
    %c0_i32_0 = arith.constant 0 : i32
    return %arg0, %c0_i32 : i32, i32
  }
  func.func @transform_5(%arg0: i32) -> (i32, i32) {
    %c0_i32 = arith.constant 0 : i32
    %c0_i32_0 = arith.constant 0 : i32
    return %arg0, %c0_i32 : i32, i32
  }
}

</mosaic_0001>

<bundles_post_ra>
// kernel: tpu_custom_call.1
= control target key start
LH: loop header
LB: loop body
LE: loop exit
PB: predicated region body
PF: predicated region fallthrough
CT: control target
= control target key end

     0   :  { %s2182_s0 = inlined_call_operand.hbm [shape: f32[256,128], index: 0, kind: input, shape index: {}]   ;;  %s2183_s1 = inlined_call_operand.hbm [shape: bf16[128,384], index: 1, kind: input, shape index: {}]   ;;  %s2184_s2 = inlined_call_operand.vmem [shape: f32[1,384], index: 2, kind: input, shape index: {}]   ;;  %s2185_s3 = inlined_call_operand.hbm [shape: bf16[256,128], index: 3, kind: output, shape index: {0}]   ;;  %s2186_s4 = inlined_call_operand.hbm [shape: bf16[256,128], index: 4, kind: output, shape index: {1}]   ;;  %s2187_s5 = inlined_call_operand.hbm [shape: bf16[256,128], index: 5, kind: output, shape index: {2}]  }
   0x1   :  { %2193 = sst [smem:[#allocation15_spill]] %s2182_s0 }
   0x2   :  { %11 = vsyncpa [#allocation3], 0 }
   0x3   :  { %13 = vsyncpa [#allocation3 + $0x1], 0 }
   0x4   :  { %14 = vsyncpa [#allocation6], 0 }
   0x5   :  { %15 = vsyncpa [#allocation4], 0 }
   0x6   :  { %17 = vsyncpa [#allocation4 + $0x1], 0 }
   0x7   :  { %18 = vsyncpa [#allocation9], 0 }
   0x8   :  { %20 = vsyncpa [#allocation9 + $0x1], 0  ;;  %s1813_s18 = smov 0   ;;  %s1815_s19 = smov 0  }
   0x9   :  { %s1817_s20 = smov 0   ;;  %s1819_s21 = smov 0  }
   0xa LB: > { %s1834_s22 = sadd.s32 4294967295, %s1769_s21   ;;  %s2192_s23 = sadd.s32 4294967294, %s1769_s21   ;;  %s1769_s21 = sphi %s1819_s21, %s2213_s21   ;;  %s1765_s20 = sphi %s1817_s20, %s2212_s20   ;;  %s1761_s19 = sphi %s1815_s19, %s2211_s19   ;;  %s1757_s18 = sphi %s1813_s18, %s2210_s18  }
   0xb   : > { %p46_p0 = scmp.ne.s32.totalorder %s1761_s19, %s1757_s18  ;;  %p2188_p1 = scmp.eq.s32.totalorder %s1834_s22, 0 }
   0xc   : > { %p118_p3 = scmp.eq.s32.totalorder %s2192_s23, 1  ;;  %p1149_p5 = scmp.ge.s32.totalorder %s1769_s21, 1 }
   0xd   : > { %p1845_p4 = por %p2188_p1, %p46_p0  ;;  %p177_p7 = scmp.lt.s32.totalorder %s1769_s21, 3 }
   0xe   : > { %p1850_p6 = por %p118_p3, %p46_p0  ;;  %s1771_s27 = smov [#allocation5]  }
   0xf   : > { %s2194_s24 = scalar_select %p1845_p4, 1, 0 }
  0x10   : > { %s2195_s25 = scalar_select %p1850_p6, 1, 0 }
  0x11   : > { %p1855_p8 = pnand %p1149_p5, %p177_p7  ;;  %s189_s28 = sshll.u32 %s1771_s27, 4  ;;  %s190_s28 = int_to_ptr.vmem [resolvable:$true] %s189_s28 }
  0x12   : > { %s1869_s30 = sadd.s32 1, %s1769_s21   ;;  %s33_s6 = sadd.s32 1, %s1765_s20 }
  0x13   : > { %s2196_s26 = scalar_select %p1855_p8, 1, 0 }
  0x14   : > { %p1497_p9 = pneg %p1855_p8  ;;  %s30_s7 = ssub.s32 %s1769_s21, %s1869_s30 }
  0x15   : > { %s1602_s8 = scalar_lea.vmem %s190_s28, 3072  ;;  %p1610_p5 = scmp.lt.s32.totalorder %s190_s28, %s190_s28 }
  0x16   : > { %p1864_p11 = pnand %p1497_p9, %p2188_p1  ;;  %p1603_p13 = scmp.ne.s32.totalorder %s190_s28, %s1602_s8 }
  0x17   : > { %p1611_p7 = scmp.lt.s32.totalorder %s1602_s8, %s1602_s8 }
  0x18   : > { %p1593_p12 = pneg %p1864_p11 }
  0x19   : > { %p1612_p10 = por %p1611_p7, %p1610_p5 }
  0x1a   : > { %p1605_p0 = pnand %p1603_p13, %p1593_p12 }
  0x1c   : > { %p1606_p3 = pneg %p1605_p0 }
  0x1e   : > { %p1613_p2 = pnand %p1612_p10, %p1606_p3 }
  0x20   : > { %1616 = shalt.err (!%p1613_p2)
}
  0x21   : > { %s1772_s9 = smov 192   ;;  %s1773_s10 = smov 12  }
  0x22   : > { %1500 = dma.hbm_to_vmem [thread:$0]  (!%p1864_p11), %s2183_s1, 3072, %s190_s28, [#allocation6], %s1772_s9, %s1772_s9, %s1773_s10  }
  0x23   : > { %p31_p9 = scmp.eq.s32.totalorder %s30_s7, 0  ;;  %p40_p12 = scmp.ne.s32.totalorder %s1765_s20, %s1761_s19 }
  0x24   : > { %p41_p10 = scmp.eq.s32.totalorder %s1769_s21, 0  ;;  %p1516_p2 = scmp.lt.s32.totalorder %s1769_s21, 2 }
  0x25   : > { %s1886_s13 = scalar_select %p31_p9, %s1765_s20, %s33_s6  }
  0x26   : > { %p42_p13 = por %p41_p10, %p40_p12  ;;  %p2198_p0 = scmp.eq.s32.totalorder %s1834_s22, 1 }
  0x27   : > { %s206_s15 = sand.u32 1, %s1765_s20   ;;  %s1244_s16 = sshll.u32 %s1769_s21, 11 }
  0x28   : > { %p1890_p3 = por %p2198_p0, %p40_p12  ;;  %s1152_s17 = sshll.u32 %s206_s15, 7 }
  0x29   : > { %s2200_s0 = sld [smem:[#allocation15_spill]]  ;;  %s210_s28 = scalar_lea.vmem [#allocation2], %s1152_s17 }
  0x2a   : > { %s2199_s14 = scalar_select %p1890_p3, 1, 0 }
  0x2b   : > { %s217_s6 = sshll.u32 %s210_s28, 4  ;;  %p1901_p11 = pnand %p1516_p2, %p42_p13  ;;  %s1905_s6 = int_to_ptr.vmem [resolvable:$true] %s217_s6 }
  0x2c   : > { %s1907_s9 = scalar_lea.sflag [#allocation3], %s206_s15 }
  0x2d   : > { %p1619_p7 = pneg %p1901_p11 }
  0x2f   : > { %s1899_s8 = scalar_lea.hbm %s2200_s0, %s1244_s16  ;;  %s1622_s16 = scalar_lea.hbm %s2200_s0, 4096 }
  0x30   : > { %s1617_s10 = scalar_lea.hbm %s1899_s8, 2048  ;;  %p1623_p10 = scmp.lt.s32.totalorder %s1899_s8, %s2200_s0 }
  0x31   : > { %p1618_p5 = scmp.ne.s32.totalorder %s1899_s8, %s1617_s10  ;;  %p1624_p2 = scmp.lt.s32.totalorder %s1622_s16, %s1617_s10 }
  0x33   : > { %p1620_p9 = pnand %p1619_p7, %p1618_p5  ;;  %p1625_p13 = por %p1624_p2, %p1623_p10 }
  0x35   : > { %p1621_p12 = pneg %p1620_p9 }
  0x37   : > { %p1626_p0 = pnand %p1625_p13, %p1621_p12 }
  0x39   : > { %1629 = shalt.err (!%p1626_p0)
}
  0x3a   : > { %s1630_s15 = scalar_lea.vmem %s1905_s6, 2048  ;;  %s1774_s29 = smov [#allocation2]  }
  0x3b   : > { %p1631_p1 = scmp.ne.s32.totalorder %s1905_s6, %s1630_s15  ;;  %s1635_s28 = sshll.u32 %s1774_s29, 4  ;;  %s1636_s28 = int_to_ptr.vmem [resolvable:$false] %s1635_s28 }
  0x3c   : > { %s1637_s11 = scalar_lea.vmem %s1636_s28, 4096  ;;  %p1638_p9 = scmp.lt.s32.totalorder %s1905_s6, %s1636_s28 }
  0x3d   : > { %p1633_p6 = pnand %p1631_p1, %p1619_p7  ;;  %p1639_p3 = scmp.lt.s32.totalorder %s1637_s11, %s1630_s15 }
  0x3f   : > { %p1634_p5 = pneg %p1633_p6  ;;  %p1640_p4 = por %p1639_p3, %p1638_p9 }
  0x41   : > { %p1641_p8 = pnand %p1640_p4, %p1634_p5 }
  0x43   : > { %1644 = shalt.err (!%p1641_p8)
}
  0x44   : > { %s1775_s10 = smov 128   ;;  %s1776_s12 = smov 8  }
  0x45   : > { %1504 = dma.hbm_to_vmem [thread:$0]  (!%p1901_p11), %s1899_s8, 2048, %s1905_s6, %s1907_s9, %s1775_s10, %s1775_s10, %s1776_s12  }
  0x46   : > { %p2202_p1 = scmp.ne.s32.totalorder %s2196_s26, 0 }
  0x47   : > { %s1931_s16 = sand.u32 (!%p2202_p1), 1, %s1761_s19   ;;  %p2203_p4 = scmp.ne.s32.totalorder (!%p2202_p1), %s2194_s24, 0 }
  0x48   : > { %229 = sbr.rel (%p2202_p1) target bundleno = 430 (0x1ae), region = 32  ;;  %s1156_s17 = sshll.u32 (!%p2202_p1), %s1931_s16, 7 }
  0x49   : > { %s232_s27 = scalar_lea.sflag (!%p2202_p1), [#allocation3], %s1931_s16  ;;  %s1935_s15 = scalar_lea.vmem (!%p2202_p1), [#allocation2], %s1156_s17 }
  0x4d   : > { %1740 = dma.done.wait (%p2203_p4), %s232_s27, 2048  }
  0x4e   : > { %1742 = vsyncadd (%p2203_p4), %s232_s27, 4294965248  ;;  %p2204_p6 = scmp.eq.s32.totalorder %s1834_s22, 0 }
  0x50   : > { %1744 = dma.done.wait (%p2204_p6), [#allocation6], 3072   ;;  %p2205_p8 = pmov %p2204_p6 }
  0x51   : > { %v1777_v0 = vmov 0   ;;  %v1559_v1 = vld [vmem:[#allocation5 + $0xac] ss:$12 sps:$4 sm:$0xff]   ;;  %v1561_v2 = vld [vmem:[#allocation5 + $0xa8] ss:$12 sps:$4 sm:$0xff]   ;;  %v281_v12 = vld [vmem:[%s1935_s15] sm:$0xff]  ;;  %v339_v49 = vlaneseq }
  0x52   : > { %1746 = vsyncadd (%p2205_p8), [#allocation6], 4294964224  ;;  %514 = vmatprep.mubr.bf16.mxu0 %v1777_v0  ;;  %482 = vmatprep.subr.bf16.mxu0 %v1559_v1  ;;  %v1562_v3 = vld [vmem:[#allocation5 + $0x94] ss:$12 sps:$4 sm:$0xff]   ;;  %v1564_v4 = vld [vmem:[#allocation5 + $0x90] ss:$12 sps:$4 sm:$0xff]  }
  0x53   : > { %483 = vmatpush1.bf16.msra.mxu0 %v1561_v2  ;;  %v1565_v5 = vld [vmem:[#allocation5 + $0x7c] ss:$12 sps:$4 sm:$0xff]   ;;  %v1567_v6 = vld [vmem:[#allocation5 + $0x78] ss:$12 sps:$4 sm:$0xff]   ;;  %v1570_v9 = vld [vmem:[#allocation5 + $0x60] ss:$12 sps:$4 sm:$0xff]  }
  0x54   : > { %484 = vmatprep.subr.bf16.mxu0 %v1562_v3  ;;  %v1568_v7 = vld [vmem:[#allocation5 + $0x64] ss:$12 sps:$4 sm:$0xff]   ;;  %v1571_v10 = vld [vmem:[#allocation5 + $0x4c] ss:$12 sps:$4 sm:$0xff]   ;;  %v1573_v16 = vld [vmem:[#allocation5 + $0x48] ss:$12 sps:$4 sm:$0xff]  }
  0x55   : > { %v1580_v8 = vld [vmem:[#allocation5 + $0xb0] ss:$12 sps:$4 sm:$0xff]   ;;  %v1584_v11 = vld [vmem:[#allocation5 + $0x98] ss:$12 sps:$4 sm:$0xff]   ;;  %v282_v13 = vld [vmem:[%s1935_s15 + $0x8] sm:$0xff]  ;;  %v340_v50 = vshrl.u32 %v339_v49, 7 }
  0x56   : > { %1453 = vmatprep.subr.bf16.mxu1 %v1580_v8  ;;  %v297_v14 = vpack.c.bf16 %v282_v13, %v281_v12  ;;  %v1585_v15 = vld [vmem:[#allocation5 + $0x80] ss:$12 sps:$4 sm:$0xff]   ;;  %v1586_v18 = vld [vmem:[#allocation5 + $0x68] ss:$12 sps:$4 sm:$0xff]   ;;  %v1576_v19 = vld [vmem:[#allocation5 + $0x30] ss:$12 sps:$4 sm:$0xff]  }
  0x57   : > { %485 = vmatpush1.bf16.msra.mxu0 %v1564_v4  ;;  %1454 = vmatpush3.bf16.msra.mxu1 %v1580_v8  ;;  %v1574_v17 = vld [vmem:[#allocation5 + $0x34] ss:$12 sps:$4 sm:$0xff]   ;;  %v1577_v20 = vld [vmem:[#allocation5 + $0x1c] ss:$12 sps:$4 sm:$0xff]   ;;  %v1579_v22 = vld [vmem:[#allocation5 + $0x18] ss:$12 sps:$4 sm:$0xff]  }
  0x58   : > { %486 = vmatprep.subr.bf16.mxu0 %v1565_v5  ;;  %1455 = vmatprep.subr.bf16.mxu1 %v1584_v11  ;;  %v1587_v21 = vld [vmem:[#allocation5 + $0x50] ss:$12 sps:$4 sm:$0xff]   ;;  %v1588_v24 = vld [vmem:[#allocation5 + $0x38] ss:$12 sps:$4 sm:$0xff]   ;;  %v1583_v25 = vld [vmem:[#allocation5] ss:$12 sps:$4 sm:$0xff]  }
  0x59   : > { %1469 = vmatprep.mubr.bf16.mxu1 %v297_v14  ;;  %v1581_v23 = vld [vmem:[#allocation5 + $0x4] ss:$12 sps:$4 sm:$0xff]   ;;  %v1589_v26 = vld [vmem:[#allocation5 + $0x20] ss:$12 sps:$4 sm:$0xff]   ;;  %v1590_v27 = vld [vmem:[#allocation5 + $0x8] ss:$12 sps:$4 sm:$0xff]  }
  0x5a   : > { %v283_v28 = vld [vmem:[%s1935_s15 + $0x10] sm:$0xff]  ;;  %v284_v29 = vld [vmem:[%s1935_s15 + $0x18] sm:$0xff]  ;;  %v285_v31 = vld [vmem:[%s1935_s15 + $0x20] sm:$0xff]  ;;  %v341_v51 = vsub.s32 0, %v340_v50  ;;  %v345_v54 = vsub.s32 1, %v340_v50  ;;  %s1978_s8 = sshll.u32 %s1931_s16, 6 }
  0x5b   : > { %487 = vmatpush1.bf16.msra.mxu0 %v1567_v6  ;;  %1456 = vmatpush3.bf16.msra.mxu1 %v1584_v11  ;;  %v298_v30 = vpack.c.bf16 %v284_v29, %v283_v28  ;;  %v286_v32 = vld [vmem:[%s1935_s15 + $0x28] sm:$0xff]  ;;  %v287_v34 = vld [vmem:[%s1935_s15 + $0x30] sm:$0xff]  ;;  %v288_v35 = vld [vmem:[%s1935_s15 + $0x38] sm:$0xff]  ;;  %v349_v61 = vsub.s32 2, %v340_v50  ;;  %s1987_s6 = scalar_lea.vmem [#allocation7], %s1978_s8  ;;  %s1991_s7 = scalar_lea.vmem [#allocation8], %s1978_s8 }
  0x5c   : > { %488 = vmatprep.subr.bf16.mxu0 %v1568_v7  ;;  %1457 = vmatprep.subr.bf16.mxu1 %v1585_v15  ;;  %v299_v33 = vpack.c.bf16 %v286_v32, %v285_v31  ;;  %v289_v36 = vld [vmem:[%s1935_s15 + $0x40] sm:$0xff]  ;;  %v290_v37 = vld [vmem:[%s1935_s15 + $0x48] sm:$0xff]  ;;  %v300_v38 = vpack.c.bf16 %v288_v35, %v287_v34  ;;  %v291_v40 = vld [vmem:[%s1935_s15 + $0x50] sm:$0xff]  ;;  %s2005_s9 = scalar_lea.vmem [#allocation10], %s1978_s8  ;;  %s972_s29 = sshll.u32 %s1987_s6, 4  ;;  %s2061_s29 = int_to_ptr.vmem [resolvable:$true] %s972_s29 }
  0x5d   : > { %v301_v39 = vpack.c.bf16 %v290_v37, %v289_v36  ;;  %v292_v41 = vld [vmem:[%s1935_s15 + $0x58] sm:$0xff]  ;;  %v293_v42 = vld [vmem:[%s1935_s15 + $0x60] sm:$0xff]  ;;  %v294_v43 = vld [vmem:[%s1935_s15 + $0x68] sm:$0xff]  ;;  %s988_s28 = sshll.u32 %s1991_s7, 4  ;;  %s953_s11 = sand.u32 1, %s1834_s22   ;;  %s2064_s28 = int_to_ptr.vmem [resolvable:$true] %s988_s28 }
  0x5e   : > { %v302_v44 = vpack.c.bf16 %v292_v41, %v291_v40  ;;  %v303_v45 = vpack.c.bf16 %v294_v43, %v293_v42  ;;  %v295_v46 = vld [vmem:[%s1935_s15 + $0x70] sm:$0xff]  ;;  %v296_v47 = vld [vmem:[%s1935_s15 + $0x78] sm:$0xff]  ;;  %v337_v52 = vld [vmem:[%s2184_s2] sm:$0x7]  ;;  %s1293_s10 = sshll.u32 %s1834_s22, 10  ;;  %s1004_s12 = sshll.u32 %s2005_s9, 4  ;;  %s2079_s12 = int_to_ptr.vmem [resolvable:$true] %s1004_s12 }
  0x5f   : > { %489 = vmatpush1.bf16.msra.mxu0 %v1570_v9  ;;  %1458 = vmatpush3.bf16.msra.mxu1 %v1585_v15  ;;  %v304_v48 = vpack.c.bf16 %v296_v47, %v295_v46  ;;  %v1972_v53 = vrot.slane %v337_v52, %v341_v51  ;;  %v1975_v58 = vrot.slane %v337_v52, %v345_v54  ;;  %s2072_s15 = scalar_lea.hbm %s2186_s4, %s1293_s10  ;;  %s2077_s26 = scalar_lea.hbm %s2185_s3, %s1293_s10 }
  0x60   : > { %490 = vmatprep.subr.bf16.mxu0 %v1571_v10  ;;  %1459 = vmatprep.subr.bf16.mxu1 %v1586_v18  ;;  %v1983_v6 = vrot.slane %v337_v52, %v349_v61  ;;  %s2086_s23 = scalar_lea.hbm %s2187_s5, %s1293_s10  ;;  %s2088_s0 = scalar_lea.sflag [#allocation9], %s953_s11 }
  0x61   : > { %s1645_s17 = scalar_lea.vmem %s2064_s28, 1024  ;;  %p2206_p11 = scmp.ne.s32.totalorder %s2199_s14, 0 }
  0x62   : > { %p1646_p3 = scmp.ne.s32.totalorder %s2064_s28, %s1645_s17  ;;  %s1778_s27 = smov [#allocation8]  }
  0x63   : > { %491 = vmatpush1.bf16.msra.mxu0 %v1573_v16  ;;  %1460 = vmatpush3.bf16.msra.mxu1 %v1586_v18  ;;  %s1649_s22 = sshll.u32 %s1778_s27, 4  ;;  %s1650_s22 = int_to_ptr.vmem [resolvable:$false] %s1649_s22 }
  0x64   : > { %492 = vmatprep.subr.bf16.mxu0 %v1574_v17  ;;  %1461 = vmatprep.subr.bf16.mxu1 %v1587_v21  ;;  %p1647_p7 = pnand %p1646_p3, %p2206_p11  ;;  %s1651_s24 = scalar_lea.vmem %s1650_s22, 2048 }
  0x65   : > { %p1652_p10 = scmp.lt.s32.totalorder %s2064_s28, %s1650_s22  ;;  %p1653_p2 = scmp.lt.s32.totalorder %s1651_s24, %s1645_s17 }
  0x66   : > { %p1648_p12 = pneg %p1647_p7 }
  0x67   : > { %493 = vmatpush1.bf16.msra.mxu0 %v1576_v19  ;;  %1462 = vmatpush3.bf16.msra.mxu1 %v1587_v21  ;;  %p1654_p13 = por %p1653_p2, %p1652_p10 }
  0x68   : > { %494 = vmatprep.subr.bf16.mxu0 %v1577_v20  ;;  %1463 = vmatprep.subr.bf16.mxu1 %v1588_v24 }
  0x69   : > { %p1655_p0 = pnand %p1654_p13, %p1648_p12 }
  0x6b   : > { %495 = vmatpush1.bf16.msra.mxu0 %v1579_v22  ;;  %1464 = vmatpush3.bf16.msra.mxu1 %v1588_v24 }
  0x6c   : > { %496 = vmatprep.subr.bf16.mxu0 %v1581_v23  ;;  %1465 = vmatprep.subr.bf16.mxu1 %v1589_v26 }
  0x6f   : > { %497 = vmatpush1.bf16.msra.mxu0 %v1583_v25  ;;  %1466 = vmatpush3.bf16.msra.mxu1 %v1589_v26 }
  0x70   : > { %1467 = vmatprep.subr.bf16.mxu1 %v1590_v27 }
  0x72   : > { %515 = vmatmul.mubr.bf16.vlgmr.msra.gmra.mxu0 %v297_v14 }
  0x73   : > { %524 = vmatprep.mubr.bf16.mxu0 %v1777_v0  ;;  %1468 = vmatpush3.bf16.msra.mxu1 %v1590_v27 }
  0x76   : > { %1470 = vmatmul.mubr.bf16.vlgmr.msra.gmra.mxu1 %v298_v30 }
  0x77   : > { %1473 = vmatprep.mubr.bf16.mxu1 %v299_v33 }
  0x7a   : > { %525 = vmatmul.mubr.bf16.gmra.mxu0 %v298_v30 }
  0x7b   : > { %534 = vmatprep.mubr.bf16.mxu0 %v1777_v0 }
  0x7e   : > { %1474 = vmatmul.mubr.bf16.gmra.mxu1 %v300_v38 }
  0x7f   : > { %1477 = vmatprep.mubr.bf16.mxu1 %v301_v39 }
  0x82   : > { %535 = vmatmul.mubr.bf16.gmra.mxu0 %v299_v33 }
  0x83   : > { %544 = vmatprep.mubr.bf16.mxu0 %v1777_v0 }
  0x86   : > { %1478 = vmatmul.mubr.bf16.gmra.mxu1 %v302_v44 }
  0x87   : > { %1481 = vmatprep.mubr.bf16.mxu1 %v303_v45 }
  0x8a   : > { %545 = vmatmul.mubr.bf16.gmra.mxu0 %v300_v38 }
  0x8b   : > { %554 = vmatprep.mubr.bf16.mxu0 %v1777_v0 }
  0x8e   : > { %1482 = vmatmul.mubr.bf16.gmra.mxu1 %v304_v48 }
  0x92   : > { %555 = vmatmul.mubr.bf16.gmra.mxu0 %v301_v39 }
  0x93   : > { %564 = vmatprep.mubr.bf16.mxu0 %v1777_v0 }
  0x9a   : > { %565 = vmatmul.mubr.bf16.gmra.mxu0 %v302_v44 }
  0x9b   : > { %574 = vmatprep.mubr.bf16.mxu0 %v1777_v0 }
  0xa2   : > { %575 = vmatmul.mubr.bf16.gmra.mxu0 %v303_v45 }
  0xa3   : > { %584 = vmatprep.mubr.bf16.mxu0 %v1777_v0 }
  0xaa   : > { %585 = vmatmul.mubr.bf16.gmra.mxu0 %v304_v48 }
 0x132   : > { %v516_v55 = vpop.f32.mrf.mxu0 }
 0x133   : > { %v517_v57 = vadd.f32 %v516_v55, %v1972_v53 }
 0x134   : > { %v518_v56 = vpop.f32.mrf.mxu0 }
 0x135   : > { %v692_v63 = vmul.f32 0.088388346, %v517_v57  ;;  %v519_v0 = vadd.f32 %v518_v56, %v1975_v58 }
 0x136   : > { %v520_v59 = vpop.f32.mrf.mxu0  ;;  %v1471_v9 = vpop.f32.mrf.mxu1 }
 0x137   : > { %v521_v60 = vadd.f32 %v520_v59, %v1972_v53  ;;  %v638_v13 = vadd.f32 %v1471_v9, %v1983_v6 }
 0x138   : > { %v522_v62 = vpop.f32.mrf.mxu0  ;;  %v629_v11 = vpop.f32.mrf.mxu1 }
 0x139   : > { %v693_v1 = vmul.f32 0.088388346, %v521_v60  ;;  %v523_v2 = vadd.f32 %v522_v62, %v1975_v58  ;;  %v630_v22 = vadd.f32 %v629_v11, %v1983_v6 }
 0x13a   : > { %v526_v3 = vpop.f32.mrf.mxu0  ;;  %v1472_v16 = vpop.f32.mrf.mxu1 }
 0x13b   : > { %v1299_v4 = vpack.c.bf16 %v693_v1, %v692_v63  ;;  %v1339_v5 = vpack.c.bf16 %v523_v2, %v519_v0  ;;  %v527_v7 = vadd.f32 %v526_v3, %v1972_v53  ;;  %v641_v20 = vadd.f32 %v1472_v16, %v1983_v6 }
 0x13c   : > { %v528_v8 = vpop.f32.mrf.mxu0  ;;  %v632_v23 = vpop.f32.mrf.mxu1 }
 0x13d   : > { %1300 = vst [vmem:[%s1987_s6] sm:$0xff] %v1299_v4   ;;  %1340 = vst [vmem:[%s1991_s7] sm:$0xff] %v1339_v5   ;;  %v694_v14 = vmul.f32 0.088388346, %v527_v7  ;;  %v529_v17 = vadd.f32 %v528_v8, %v1975_v58  ;;  %v1384_v26 = vpack.c.bf16 %v641_v20, %v638_v13  ;;  %v633_v29 = vadd.f32 %v632_v23, %v1983_v6 }
 0x13e   : > { %v530_v10 = vpop.f32.mrf.mxu0  ;;  %v1475_v30 = vpop.f32.mrf.mxu1 }
 0x13f   : > { %v531_v12 = vadd.f32 %v530_v10, %v1972_v53  ;;  %1430 = vst [vmem:[%s2005_s9 + $0x8] sm:$0xff] %v1384_v26   ;;  %v1379_v32 = vpack.c.bf16 %v633_v29, %v630_v22  ;;  %v654_v35 = vadd.f32 %v1475_v30, %v1983_v6 }
 0x140   : > { %v532_v15 = vpop.f32.mrf.mxu0  ;;  %v645_v33 = vpop.f32.mrf.mxu1 }
 0x141   : > { %v695_v18 = vmul.f32 0.088388346, %v531_v12  ;;  %v533_v19 = vadd.f32 %v532_v15, %v1975_v58  ;;  %1380 = vst [vmem:[%s2005_s9] sm:$0xff] %v1379_v32   ;;  %v646_v44 = vadd.f32 %v645_v33, %v1983_v6 }
 0x142   : > { %v536_v21 = vpop.f32.mrf.mxu0  ;;  %v1476_v38 = vpop.f32.mrf.mxu1 }
 0x143   : > { %v1304_v24 = vpack.c.bf16 %v695_v18, %v694_v14  ;;  %v1344_v25 = vpack.c.bf16 %v533_v19, %v529_v17  ;;  %v537_v27 = vadd.f32 %v536_v21, %v1972_v53  ;;  %v657_v42 = vadd.f32 %v1476_v38, %v1983_v6 }
 0x144   : > { %v538_v28 = vpop.f32.mrf.mxu0  ;;  %v648_v45 = vpop.f32.mrf.mxu1 }
 0x145   : > { %1416 = vst [vmem:[%s1987_s6 + $0x8] sm:$0xff] %v1304_v24   ;;  %1423 = vst [vmem:[%s1991_s7 + $0x8] sm:$0xff] %v1344_v25   ;;  %v696_v36 = vmul.f32 0.088388346, %v537_v27  ;;  %v539_v39 = vadd.f32 %v538_v28, %v1975_v58  ;;  %v1394_v48 = vpack.c.bf16 %v657_v42, %v654_v35  ;;  %v649_v51 = vadd.f32 %v648_v45, %v1983_v6 }
 0x146   : > { %v540_v31 = vpop.f32.mrf.mxu0  ;;  %v1479_v52 = vpop.f32.mrf.mxu1 }
 0x147   : > { %v541_v34 = vadd.f32 %v540_v31, %v1972_v53  ;;  %1432 = vst [vmem:[%s2005_s9 + $0x18] sm:$0xff] %v1394_v48   ;;  %v1389_v55 = vpack.c.bf16 %v649_v51, %v646_v44  ;;  %v670_v59 = vadd.f32 %v1479_v52, %v1983_v6 }
 0x148   : > { %v542_v37 = vpop.f32.mrf.mxu0  ;;  %v661_v56 = vpop.f32.mrf.mxu1 }
 0x149   : > { %v697_v40 = vmul.f32 0.088388346, %v541_v34  ;;  %v543_v41 = vadd.f32 %v542_v37, %v1975_v58  ;;  %1431 = vst [vmem:[%s2005_s9 + $0x10] sm:$0xff] %v1389_v55   ;;  %v662_v4 = vadd.f32 %v661_v56, %v1983_v6 }
 0x14a   : > { %v546_v43 = vpop.f32.mrf.mxu0  ;;  %v1480_v62 = vpop.f32.mrf.mxu1 }
 0x14b   : > { %v1309_v46 = vpack.c.bf16 %v697_v40, %v696_v36  ;;  %v1349_v47 = vpack.c.bf16 %v543_v41, %v539_v39  ;;  %v547_v49 = vadd.f32 %v546_v43, %v1972_v53  ;;  %v673_v2 = vadd.f32 %v1480_v62, %v1983_v6 }
 0x14c   : > { %v548_v50 = vpop.f32.mrf.mxu0  ;;  %v664_v5 = vpop.f32.mrf.mxu1 }
 0x14d   : > { %1417 = vst [vmem:[%s1987_s6 + $0x10] sm:$0xff] %v1309_v46   ;;  %1424 = vst [vmem:[%s1991_s7 + $0x10] sm:$0xff] %v1349_v47   ;;  %v698_v60 = vmul.f32 0.088388346, %v547_v49  ;;  %v549_v63 = vadd.f32 %v548_v50, %v1975_v58  ;;  %v1404_v9 = vpack.c.bf16 %v673_v2, %v670_v59  ;;  %v665_v12 = vadd.f32 %v664_v5, %v1983_v6 }
 0x14e   : > { %v550_v54 = vpop.f32.mrf.mxu0  ;;  %v1483_v13 = vpop.f32.mrf.mxu1 }
 0x14f   : > { %v551_v57 = vadd.f32 %v550_v54, %v1972_v53  ;;  %1434 = vst [vmem:[%s2005_s9 + $0x28] sm:$0xff] %v1404_v9   ;;  %v1399_v15 = vpack.c.bf16 %v665_v12, %v662_v4  ;;  %v686_v18 = vadd.f32 %v1483_v13, %v1983_v6 }
 0x150   : > { %v552_v61 = vpop.f32.mrf.mxu0  ;;  %v677_v16 = vpop.f32.mrf.mxu1 }
 0x151   : > { %v699_v0 = vmul.f32 0.088388346, %v551_v57  ;;  %v553_v1 = vadd.f32 %v552_v61, %v1975_v58  ;;  %1433 = vst [vmem:[%s2005_s9 + $0x20] sm:$0xff] %v1399_v15   ;;  %v678_v27 = vadd.f32 %v677_v16, %v1983_v6 }
 0x152   : > { %v556_v3 = vpop.f32.mrf.mxu0  ;;  %v1484_v21 = vpop.f32.mrf.mxu1 }
 0x153   : > { %v1314_v7 = vpack.c.bf16 %v699_v0, %v698_v60  ;;  %v1354_v8 = vpack.c.bf16 %v553_v1, %v549_v63  ;;  %v557_v10 = vadd.f32 %v556_v3, %v1972_v53  ;;  %v689_v25 = vadd.f32 %v1484_v21, %v1983_v6 }
 0x154   : > { %v558_v11 = vpop.f32.mrf.mxu0  ;;  %v680_v28 = vpop.f32.mrf.mxu1 }
 0x155   : > { %1418 = vst [vmem:[%s1987_s6 + $0x18] sm:$0xff] %v1314_v7   ;;  %1425 = vst [vmem:[%s1991_s7 + $0x18] sm:$0xff] %v1354_v8   ;;  %v700_v19 = vmul.f32 0.088388346, %v557_v10  ;;  %v559_v22 = vadd.f32 %v558_v11, %v1975_v58  ;;  %v1414_v31 = vpack.c.bf16 %v689_v25, %v686_v18  ;;  %v681_v33 = vadd.f32 %v680_v28, %v1983_v6 }
 0x156   : > { %v560_v14 = vpop.f32.mrf.mxu0 }
 0x157   : > { %v561_v17 = vadd.f32 %v560_v14, %v1972_v53  ;;  %1436 = vst [vmem:[%s2005_s9 + $0x38] sm:$0xff] %v1414_v31   ;;  %v1409_v36 = vpack.c.bf16 %v681_v33, %v678_v27 }
 0x158   : > { %v562_v20 = vpop.f32.mrf.mxu0 }
 0x159   : > { %v701_v23 = vmul.f32 0.088388346, %v561_v17  ;;  %v563_v24 = vadd.f32 %v562_v20, %v1975_v58  ;;  %1435 = vst [vmem:[%s2005_s9 + $0x30] sm:$0xff] %v1409_v36  }
 0x15a   : > { %v566_v26 = vpop.f32.mrf.mxu0 }
 0x15b   : > { %v1319_v29 = vpack.c.bf16 %v701_v23, %v700_v19  ;;  %v1359_v30 = vpack.c.bf16 %v563_v24, %v559_v22  ;;  %v567_v34 = vadd.f32 %v566_v26, %v1972_v53 }
 0x15c   : > { %v568_v32 = vpop.f32.mrf.mxu0 }
 0x15d   : > { %1419 = vst [vmem:[%s1987_s6 + $0x20] sm:$0xff] %v1319_v29   ;;  %1426 = vst [vmem:[%s1991_s7 + $0x20] sm:$0xff] %v1359_v30   ;;  %v702_v39 = vmul.f32 0.088388346, %v567_v34  ;;  %v569_v40 = vadd.f32 %v568_v32, %v1975_v58 }
 0x15e   : > { %v570_v35 = vpop.f32.mrf.mxu0 }
 0x15f   : > { %v571_v37 = vadd.f32 %v570_v35, %v1972_v53 }
 0x160   : > { %v572_v38 = vpop.f32.mrf.mxu0 }
 0x161   : > { %v703_v41 = vmul.f32 0.088388346, %v571_v37  ;;  %v573_v42 = vadd.f32 %v572_v38, %v1975_v58 }
 0x162   : > { %v576_v6 = vpop.f32.mrf.mxu0 }
 0x163   : > { %v1324_v43 = vpack.c.bf16 %v703_v41, %v702_v39  ;;  %v1364_v44 = vpack.c.bf16 %v573_v42, %v569_v40  ;;  %v577_v46 = vadd.f32 %v576_v6, %v1972_v53 }
 0x164   : > { %v578_v45 = vpop.f32.mrf.mxu0 }
 0x165   : > { %1420 = vst [vmem:[%s1987_s6 + $0x28] sm:$0xff] %v1324_v43   ;;  %1427 = vst [vmem:[%s1991_s7 + $0x28] sm:$0xff] %v1364_v44   ;;  %v704_v50 = vmul.f32 0.088388346, %v577_v46  ;;  %v579_v51 = vadd.f32 %v578_v45, %v1975_v58 }
 0x166   : > { %v580_v47 = vpop.f32.mrf.mxu0 }
 0x167   : > { %v581_v48 = vadd.f32 %v580_v47, %v1972_v53 }
 0x168   : > { %v582_v49 = vpop.f32.mrf.mxu0 }
 0x169   : > { %v705_v52 = vmul.f32 0.088388346, %v581_v48  ;;  %v583_v54 = vadd.f32 %v582_v49, %v1975_v58 }
 0x16a   : > { %v586_v55 = vpop.f32.mrf.mxu0 }
 0x16b   : > { %v1329_v56 = vpack.c.bf16 %v705_v52, %v704_v50  ;;  %v1369_v57 = vpack.c.bf16 %v583_v54, %v579_v51  ;;  %v587_v60 = vadd.f32 %v586_v55, %v1972_v53 }
 0x16c   : > { %v588_v59 = vpop.f32.mrf.mxu0 }
 0x16d   : > { %1421 = vst [vmem:[%s1987_s6 + $0x30] sm:$0xff] %v1329_v56   ;;  %1428 = vst [vmem:[%s1991_s7 + $0x30] sm:$0xff] %v1369_v57   ;;  %v706_v0 = vmul.f32 0.088388346, %v587_v60  ;;  %v589_v1 = vadd.f32 %v588_v59, %v1975_v58 }
 0x16e   : > { %v590_v61 = vpop.f32.mrf.mxu0 }
 0x16f   : > { %v591_v62 = vadd.f32 %v590_v61, %v1972_v53 }
 0x170   : > { %v592_v63 = vpop.f32.mrf.mxu0 }
 0x171   : > { %v707_v2 = vmul.f32 0.088388346, %v591_v62  ;;  %v593_v3 = vadd.f32 %v592_v63, %v1975_v58 }
 0x173   : > { %v1334_v53 = vpack.c.bf16 %v707_v2, %v706_v0  ;;  %v1374_v4 = vpack.c.bf16 %v593_v3, %v589_v1 }
 0x175   : > { %1422 = vst [vmem:[%s1987_s6 + $0x38] sm:$0xff] %v1334_v53   ;;  %1429 = vst [vmem:[%s1991_s7 + $0x38] sm:$0xff] %v1374_v4  }
 0x176   : > { %1658 = shalt.err (!%p1655_p0)
}
 0x177   : > { %s1659_s6 = scalar_lea.hbm %s2072_s15, 1024  ;;  %s1663_s10 = scalar_lea.hbm %s2186_s4, 2048 }
 0x178   : > { %p1660_p5 = scmp.ne.s32.totalorder %s2072_s15, %s1659_s6  ;;  %p1664_p4 = scmp.lt.s32.totalorder %s2072_s15, %s2186_s4 }
 0x179   : > { %p1665_p6 = scmp.lt.s32.totalorder %s1663_s10, %s1659_s6 }
 0x17a   : > { %p1661_p9 = pnand %p1660_p5, %p2206_p11 }
 0x17b   : > { %p1666_p8 = por %p1665_p6, %p1664_p4 }
 0x17c   : > { %p1662_p1 = pneg %p1661_p9 }
 0x17e   : > { %p1667_p3 = pnand %p1666_p8, %p1662_p1 }
 0x180   : > { %1670 = shalt.err (!%p1667_p3)
}
 0x181   : > { %s1779_s17 = smov 64   ;;  %s1780_s27 = smov 4  }
 0x182   : > { %1492 = dma.vmem_to_hbm [thread:$0]  (%p2206_p11), %s2064_s28, 1024, %s2072_s15, %s2088_s0, %s1779_s17, %s1779_s17, %s1780_s27  }
 0x183   : > { %s949_s22 = scalar_lea.sflag [#allocation4], %s1931_s16  ;;  %s1671_s24 = scalar_lea.vmem %s2061_s29, 1024 }
 0x184   : > { %p1672_p7 = scmp.ne.s32.totalorder %s2061_s29, %s1671_s24  ;;  %s1781_s6 = smov [#allocation7]  }
 0x185   : > { %s1675_s7 = sshll.u32 %s1781_s6, 4  ;;  %s1676_s7 = int_to_ptr.vmem [resolvable:$false] %s1675_s7 }
 0x186   : > { %p1673_p12 = pnand %p1672_p7, %p2206_p11  ;;  %s1677_s11 = scalar_lea.vmem %s1676_s7, 2048 }
 0x187   : > { %p1678_p2 = scmp.lt.s32.totalorder %s2061_s29, %s1676_s7  ;;  %p1679_p13 = scmp.lt.s32.totalorder %s1677_s11, %s1671_s24 }
 0x188   : > { %p1674_p10 = pneg %p1673_p12 }
 0x189   : > { %p1680_p0 = por %p1679_p13, %p1678_p2 }
 0x18b   : > { %p1681_p5 = pnand %p1680_p0, %p1674_p10 }
 0x18d   : > { %1684 = shalt.err (!%p1681_p5)
}
 0x18e   : > { %s1685_s28 = scalar_lea.hbm %s2077_s26, 1024  ;;  %s1689_s10 = scalar_lea.hbm %s2185_s3, 2048 }
 0x18f   : > { %p1686_p9 = scmp.ne.s32.totalorder %s2077_s26, %s1685_s28  ;;  %p1690_p6 = scmp.lt.s32.totalorder %s2077_s26, %s2185_s3 }
 0x190   : > { %p1691_p8 = scmp.lt.s32.totalorder %s1689_s10, %s1685_s28 }
 0x191   : > { %p1687_p1 = pnand %p1686_p9, %p2206_p11 }
 0x192   : > { %p1692_p3 = por %p1691_p8, %p1690_p6 }
 0x193   : > { %p1688_p4 = pneg %p1687_p1 }
 0x195   : > { %p1693_p7 = pnand %p1692_p3, %p1688_p4 }
 0x197   : > { %1696 = shalt.err (!%p1693_p7)
}
 0x198   : > { %1491 = dma.vmem_to_hbm [thread:$0]  (%p2206_p11), %s2061_s29, 1024, %s2077_s26, %s949_s22, %s1779_s17, %s1779_s17, %s1780_s27  }
 0x199   : > { %s1697_s24 = scalar_lea.vmem %s2079_s12, 1024  ;;  %s1782_s6 = smov [#allocation10]  }
 0x19a   : > { %p1698_p12 = scmp.ne.s32.totalorder %s2079_s12, %s1697_s24  ;;  %s1701_s7 = sshll.u32 %s1782_s6, 4  ;;  %s1702_s7 = int_to_ptr.vmem [resolvable:$false] %s1701_s7 }
 0x19b   : > { %s1703_s11 = scalar_lea.vmem %s1702_s7, 2048  ;;  %p1704_p13 = scmp.lt.s32.totalorder %s2079_s12, %s1702_s7 }
 0x19c   : > { %p1699_p10 = pnand %p1698_p12, %p2206_p11  ;;  %p1705_p0 = scmp.lt.s32.totalorder %s1703_s11, %s1697_s24 }
 0x19e   : > { %p1700_p2 = pneg %p1699_p10  ;;  %p1706_p5 = por %p1705_p0, %p1704_p13 }
 0x1a0   : > { %p1707_p9 = pnand %p1706_p5, %p1700_p2 }
 0x1a2   : > { %1710 = shalt.err (!%p1707_p9)
}
 0x1a3   : > { %s1711_s28 = scalar_lea.hbm %s2086_s23, 1024  ;;  %s1715_s22 = scalar_lea.hbm %s2187_s5, 2048 }
 0x1a4   : > { %p1712_p1 = scmp.ne.s32.totalorder %s2086_s23, %s1711_s28  ;;  %p1716_p8 = scmp.lt.s32.totalorder %s2086_s23, %s2187_s5 }
 0x1a5   : > { %p1717_p3 = scmp.lt.s32.totalorder %s1715_s22, %s1711_s28 }
 0x1a6   : > { %p1713_p4 = pnand %p1712_p1, %p2206_p11 }
 0x1a7   : > { %p1718_p7 = por %p1717_p3, %p1716_p8 }
 0x1a8   : > { %p1714_p6 = pneg %p1713_p4 }
 0x1aa   : > { %p1719_p12 = pnand %p1718_p7, %p1714_p6 }
 0x1ac   : > { %1722 = shalt.err (!%p1719_p12)
}
 0x1ad   : > { %1493 = dma.vmem_to_hbm [thread:$0]  (%p2206_p11), %s2079_s12, 1024, %s2086_s23, %s2088_s0, %s1779_s17, %s1779_s17, %s1780_s27  }
 0x1ae PF: > { %s1019_s10 = sand.u32 1, %s1757_s18   ;;  %p2207_p10 = scmp.ne.s32.totalorder %s2195_s25, 0 }
 0x1af   : > { %p2208_p2 = scmp.ge.s32.totalorder %s1769_s21, 2  ;;  %s1020_s8 = scalar_lea.sflag [#allocation4], %s1019_s10 }
 0x1b1   : > { %p1506_p13 = pnand %p2208_p2, %p2207_p10 }
 0x1b3   : > { %p1507_p0 = pneg %p1506_p13 }
 0x1b5   : > { %1748 = dma.done.wait (%p1507_p0), %s1020_s8, 1024  }
 0x1b6   : > { %1750 = vsyncadd (%p1507_p0), %s1020_s8, 4294966272  ;;  %s2209_s14 = sadd.s32 4294967294, %s1769_s21  }
 0x1b7   : > { %s1028_s9 = sand.u32 1, %s2209_s14  }
 0x1b8   : > { %s1029_s24 = scalar_lea.sflag [#allocation9], %s1028_s9 }
 0x1b9   : > { %1752 = dma.done.wait (%p1507_p0), %s1029_s24, 2048  }
 0x1ba   : > { %1754 = vsyncadd (%p1507_p0), %s1029_s24, 4294965248  ;;  %p23_p11 = scmp.ge.s32.totalorder %s1869_s30, 4   ;;  %s2210_s18 = smov %s1761_s19 }
 0x1bb   : > { %s2211_s19 = smov %s1765_s20  ;;  %s2212_s20 = smov %s1886_s13 }
 0x1bc   : > { %s2213_s21 = smov %s1869_s30  ;;  %25 = sbr.rel (!%p23_p11) target bundleno = 10 (0xa), region = 113 }
 0x1c1   :  { %1043 = vsyncpa [#allocation3], 1 }
 0x1c2   :  { %1045 = vsyncpa [#allocation3 + $0x1], 1 }
 0x1c3   :  { %1046 = vsyncpa [#allocation6], 1 }
 0x1c4   :  { %1047 = vsyncpa [#allocation4], 1 }
 0x1c5   :  { %1049 = vsyncpa [#allocation4 + $0x1], 1 }
 0x1c6   :  { %1050 = vsyncpa [#allocation9], 1 }
 0x1c7   :  { %1052 = vsyncpa [#allocation9 + $0x1], 1 }

</bundles_post_ra>
